<compile_context>
chip_gen: v5e
topology: v5e:2x2
jax: 0.10.0
libtpu: 0.0.40
codegen_flags: <defaults>
</compile_context>

<pallas_src>
import jax
import jax.numpy as jnp
from jax.experimental import pallas as pl
from jax.experimental.pallas import tpu as pltpu


def _fmix32(h):
    """murmur3 finalizer: avalanche-mix a uint32 value (pure jnp, portable)."""
    h = h ^ (h >> jnp.uint32(16))
    h = h * jnp.uint32(0x85EBCA6B)
    h = h ^ (h >> jnp.uint32(13))
    h = h * jnp.uint32(0xC2B2AE35)
    h = h ^ (h >> jnp.uint32(16))
    return h


def _make_attack_kernel(laplace_scale, tm, tk, k_pad):
    scale = float(laplace_scale)

    def attack_kernel(seed_ref, x_ref, w_ref, b_ref, o_ref, acc_ref):
        i = pl.program_id(0)            # M (batch) tile
        k = pl.program_id(2)            # K (feature) tile — reduction, innermost
        nk = pl.num_programs(2)

        @pl.when(k == 0)
        def _init():
            acc_ref[...] = jnp.zeros_like(acc_ref)

        # ---- Laplace noise on this [tm, tk] x-tile (stateless hash PRNG) ----
        x = x_ref[...]                                               # f32 tile
        row = jax.lax.broadcasted_iota(jnp.int32, (tm, tk), 0).astype(jnp.uint32)
        col = jax.lax.broadcasted_iota(jnp.int32, (tm, tk), 1).astype(jnp.uint32)
        g_row = row + i.astype(jnp.uint32) * jnp.uint32(tm)
        g_col = col + k.astype(jnp.uint32) * jnp.uint32(tk)
        ctr = g_row * jnp.uint32(k_pad) + g_col                      # global elem id
        h = ctr ^ (seed_ref[0].astype(jnp.uint32) * jnp.uint32(0x9E3779B9))
        h = _fmix32(h)
        h = _fmix32(h ^ jnp.uint32(0x9E3779B9))

        # exponent-bitcast uniform: top 23 random bits -> f32 in [1, 2)
        fbits = (h >> jnp.uint32(9)) | jnp.uint32(0x3F800000)
        u = jax.lax.bitcast_convert_type(fbits, jnp.float32) - 1.5   # [-0.5, 0.5)
        sgn = jnp.where(u >= 0.0, 1.0, -1.0)
        # inverse-CDF Laplace(0, scale); clamp keeps log finite at u == -0.5
        noise = (-scale) * sgn * jnp.log(jnp.maximum(1.0 - 2.0 * jnp.abs(u), 1e-12))

        x_adv = jnp.clip(x + noise, 0.0, 1.0)

        # ---- classifier dense head: bf16 MXU matmul, f32 accumulation -------
        acc_ref[...] += jnp.dot(x_adv.astype(jnp.bfloat16), w_ref[...],
                                preferred_element_type=jnp.float32)

        @pl.when(k == nk - 1)
        def _finalize():
            o_ref[...] = (acc_ref[...] + b_ref[...]).astype(o_ref.dtype)

    return attack_kernel


def _round_up(x, m):
    return (x + m - 1) // m * m


def attack_forward(imgs, labels, w, b, seed, laplace_scale=0.1):
    """Pallas-backed forward of the (Laplace-noise) attack.

    imgs:   [B, C, H, W] float32 in NCHW
    labels: [B] int32 (unused by the abstract forward; kept for signature parity)
    w:      [D, C_out] float32 classifier weight, D = C*H*W
    b:      [C_out]    float32 classifier bias
    seed:   scalar int32 PRNG seed
    returns logits [B, C_out] float32
    """
    del labels  # abstract forward defines no use of labels
    B, C, H, W = imgs.shape
    D = C * H * W
    C_out = w.shape[1]

    # Tile sizes: (8,128)-aligned, capped so double-buffered tiles + acc fit
    # comfortably inside v7x's smaller VMEM.
    tm = min(_round_up(B, 8), 256)
    tn = min(_round_up(C_out, 128), 256)
    tk = min(_round_up(D, 128), 512)
    Mp, Np, Kp = _round_up(B, tm), _round_up(C_out, tn), _round_up(D, tk)

    # Layout glue: flatten NCHW row-major (matches torch.flatten) and zero-pad.
    x_flat = imgs.reshape(B, D).astype(jnp.float32)
    x_p = jnp.zeros((Mp, Kp), jnp.float32).at[:B, :D].set(x_flat)
    # Weight stream in bf16 (dominant HBM consumer); padded K rows/N cols are 0.
    w_p = jnp.zeros((Kp, Np), jnp.bfloat16).at[:D, :C_out].set(w.astype(jnp.bfloat16))
    b_p = jnp.zeros((1, Np), jnp.float32).at[:, :C_out].set(
        b.reshape(1, C_out).astype(jnp.float32))
    seed_arr = jnp.asarray([seed], dtype=jnp.int32)

    kernel = _make_attack_kernel(float(laplace_scale), tm, tk, Kp)

    out = pl.pallas_call(
        kernel,
        out_shape=jax.ShapeDtypeStruct((Mp, Np), jnp.float32),
        grid_spec=pltpu.PrefetchScalarGridSpec(
            num_scalar_prefetch=1,                       # seed lands in SMEM
            grid=(Mp // tm, Np // tn, Kp // tk),         # K innermost (reduction)
            in_specs=[
                pl.BlockSpec((tm, tk), lambda i, j, k, seed_ref: (i, k)),
                pl.BlockSpec((tk, tn), lambda i, j, k, seed_ref: (k, j)),
                pl.BlockSpec((1, tn), lambda i, j, k, seed_ref: (0, j)),
            ],
            out_specs=pl.BlockSpec((tm, tn), lambda i, j, k, seed_ref: (i, j)),
            scratch_shapes=[pltpu.VMEM((tm, tn), jnp.float32)],
        ),
        compiler_params=pltpu.CompilerParams(
            dimension_semantics=("parallel", "parallel", "arbitrary"),
            vmem_limit_bytes=64 * 1024 * 1024,
        ),
    )(seed_arr, x_p, w_p, b_p)

    return out[:B, :C_out]


if __name__ == "__main__":
    # Small, deterministic shapes consistent with an image classifier attack.
    B, C, H, W = 8, 4, 16, 16          # batch of NCHW images
    D = C * H * W                      # 1024 flattened features
    C_out = 128                        # number of classes (lane-aligned)

    key = jax.random.PRNGKey(0)
    k_img, k_w, k_b = jax.random.split(key, 3)

    imgs = jax.random.uniform(k_img, (B, C, H, W), dtype=jnp.float32)   # [0,1) pixels
    labels = jnp.zeros((B,), dtype=jnp.int32)

    # Deterministic synthetic "classifier" parameters (linear head).
    w = jax.random.normal(k_w, (D, C_out), dtype=jnp.float32) * 0.02
    b = jax.random.normal(k_b, (C_out,), dtype=jnp.float32) * 0.02

    logits = attack_forward(imgs, labels, w, b, seed=0, laplace_scale=0.1)
    logits = jax.block_until_ready(logits)

    assert logits.shape == (B, C_out)
    assert logits.dtype == jnp.float32
    assert bool(jnp.all(jnp.isfinite(logits)))

    print("KERNEL_OK")
</pallas_src>

<mosaic_0001>
module attributes {stable_mosaic.version = 11 : i64} {
  func.func @attack_kernel(%arg0: i32, %arg1: i32, %arg2: i32, %arg3: memref<1xi32, #tpu.memory_space<smem>>, %arg4: memref<8x512xf32, #tpu.memory_space<vmem>>, %arg5: memref<512x128xbf16, #tpu.memory_space<vmem>>, %arg6: memref<1x128xf32, #tpu.memory_space<vmem>>, %arg7: memref<8x128xf32, #tpu.memory_space<vmem>>, %arg8: memref<8x128xf32, #tpu.memory_space<vmem>>) attributes {dimension_semantics = [#tpu.dimension_semantics<parallel>, #tpu.dimension_semantics<parallel>, #tpu.dimension_semantics<arbitrary>], iteration_bounds = array<i64: 1, 1, 2>, scalar_prefetch = 1 : i64, scratch_operands = 1 : i64, tpu.core_type = #tpu.core_type<tc>, window_params = [{transform_indices = @transform_0, window_bounds = array<i64: 8, 512>}, {transform_indices = @transform_1, window_bounds = array<i64: 512, 128>}, {transform_indices = @transform_2, window_bounds = array<i64: 1, 128>}, {transform_indices = @transform_3, window_bounds = array<i64: 8, 128>}]} {
    %c0_i32 = arith.constant 0 : i32
    %0 = arith.cmpi eq, %arg2, %c0_i32 : i32
    %1 = arith.extui %0 : i1 to i32
    %c0_i32_0 = arith.constant 0 : i32
    %2 = arith.cmpi ne, %1, %c0_i32_0 : i32
    scf.if %2 {
      %cst_27 = arith.constant 0.000000e+00 : f32
      %84 = vector.broadcast %cst_27 : f32 to vector<8x128xf32>
      %c0_28 = arith.constant 0 : index
      %c0_29 = arith.constant 0 : index
      %85 = vector.load %arg8[%c0_28, %c0_29] : memref<8x128xf32, #tpu.memory_space<vmem>>, vector<8x128xf32>
      tpu.vector_store %arg8[%c0_28, %c0_29], %84 {strides = array<i32>} : memref<8x128xf32, #tpu.memory_space<vmem>>, vector<8x128xf32>,
    } else {
    }
    %c0 = arith.constant 0 : index
    %c0_1 = arith.constant 0 : index
    %3 = vector.load %arg4[%c0, %c0_1] : memref<8x512xf32, #tpu.memory_space<vmem>>, vector<8x512xf32>
    %4 = tpu.iota {dimensions = array<i32: 0>} : vector<8x512xi32>
    %5 = tpu.iota {dimensions = array<i32: 1>} : vector<8x512xi32>
    %c8_i32 = arith.constant 8 : i32
    %6 = arith.muli %arg0, %c8_i32 : i32
    %7 = vector.broadcast %6 : i32 to vector<8x512xi32>
    %8 = arith.addi %4, %7 : vector<8x512xi32>
    %c512_i32 = arith.constant 512 : i32
    %9 = arith.muli %arg2, %c512_i32 : i32
    %10 = vector.broadcast %9 : i32 to vector<8x512xi32>
    %11 = arith.addi %5, %10 : vector<8x512xi32>
    %c1024_i32 = arith.constant 1024 : i32
    %12 = vector.broadcast %c1024_i32 : i32 to vector<8x512xi32>
    %13 = arith.muli %8, %12 : vector<8x512xi32>
    %14 = arith.addi %13, %11 : vector<8x512xi32>
    %c0_2 = arith.constant 0 : index
    %15 = memref.load %arg3[%c0_2] : memref<1xi32, #tpu.memory_space<smem>>
    %c-1640531527_i32 = arith.constant -1640531527 : i32
    %16 = arith.muli %15, %c-1640531527_i32 : i32
    %17 = vector.broadcast %16 : i32 to vector<8x512xi32>
    %18 = arith.xori %14, %17 : vector<8x512xi32>
    %c16_i32 = arith.constant 16 : i32
    %19 = vector.broadcast %c16_i32 : i32 to vector<8x512xi32>
    %20 = arith.shrui %18, %19 : vector<8x512xi32>
    %21 = arith.xori %18, %20 : vector<8x512xi32>
    %c-2048144789_i32 = arith.constant -2048144789 : i32
    %22 = vector.broadcast %c-2048144789_i32 : i32 to vector<8x512xi32>
    %23 = arith.muli %21, %22 : vector<8x512xi32>
    %c13_i32 = arith.constant 13 : i32
    %24 = vector.broadcast %c13_i32 : i32 to vector<8x512xi32>
    %25 = arith.shrui %23, %24 : vector<8x512xi32>
    %26 = arith.xori %23, %25 : vector<8x512xi32>
    %c-1028477387_i32 = arith.constant -1028477387 : i32
    %27 = vector.broadcast %c-1028477387_i32 : i32 to vector<8x512xi32>
    %28 = arith.muli %26, %27 : vector<8x512xi32>
    %c16_i32_3 = arith.constant 16 : i32
    %29 = vector.broadcast %c16_i32_3 : i32 to vector<8x512xi32>
    %30 = arith.shrui %28, %29 : vector<8x512xi32>
    %31 = arith.xori %28, %30 : vector<8x512xi32>
    %c-1640531527_i32_4 = arith.constant -1640531527 : i32
    %32 = vector.broadcast %c-1640531527_i32_4 : i32 to vector<8x512xi32>
    %33 = arith.xori %31, %32 : vector<8x512xi32>
    %c16_i32_5 = arith.constant 16 : i32
    %34 = vector.broadcast %c16_i32_5 : i32 to vector<8x512xi32>
    %35 = arith.shrui %33, %34 : vector<8x512xi32>
    %36 = arith.xori %33, %35 : vector<8x512xi32>
    %c-2048144789_i32_6 = arith.constant -2048144789 : i32
    %37 = vector.broadcast %c-2048144789_i32_6 : i32 to vector<8x512xi32>
    %38 = arith.muli %36, %37 : vector<8x512xi32>
    %c13_i32_7 = arith.constant 13 : i32
    %39 = vector.broadcast %c13_i32_7 : i32 to vector<8x512xi32>
    %40 = arith.shrui %38, %39 : vector<8x512xi32>
    %41 = arith.xori %38, %40 : vector<8x512xi32>
    %c-1028477387_i32_8 = arith.constant -1028477387 : i32
    %42 = vector.broadcast %c-1028477387_i32_8 : i32 to vector<8x512xi32>
    %43 = arith.muli %41, %42 : vector<8x512xi32>
    %c16_i32_9 = arith.constant 16 : i32
    %44 = vector.broadcast %c16_i32_9 : i32 to vector<8x512xi32>
    %45 = arith.shrui %43, %44 : vector<8x512xi32>
    %46 = arith.xori %43, %45 : vector<8x512xi32>
    %c9_i32 = arith.constant 9 : i32
    %47 = vector.broadcast %c9_i32 : i32 to vector<8x512xi32>
    %48 = arith.shrui %46, %47 : vector<8x512xi32>
    %c1065353216_i32 = arith.constant 1065353216 : i32
    %49 = vector.broadcast %c1065353216_i32 : i32 to vector<8x512xi32>
    %50 = arith.ori %48, %49 : vector<8x512xi32>
    %51 = tpu.bitcast %50 : vector<8x512xi32> -> vector<8x512xf32>
    %cst = arith.constant 1.500000e+00 : f32
    %52 = vector.broadcast %cst : f32 to vector<8x512xf32>
    %53 = arith.subf %51, %52 : vector<8x512xf32>
    %cst_10 = arith.constant 0.000000e+00 : f32
    %54 = vector.broadcast %cst_10 : f32 to vector<8x512xf32>
    %55 = arith.cmpf oge, %53, %54 : vector<8x512xf32>
    %cst_11 = arith.constant 1.000000e+00 : f32
    %cst_12 = arith.constant -1.000000e+00 : f32
    %56 = vector.broadcast %cst_11 : f32 to vector<8x512xf32>
    %57 = vector.broadcast %cst_12 : f32 to vector<8x512xf32>
    %58 = arith.select %55, %56, %57 : vector<8x512xi1>, vector<8x512xf32>
    %cst_13 = arith.constant -1.000000e-01 : f32
    %59 = vector.broadcast %cst_13 : f32 to vector<8x512xf32>
    %60 = arith.mulf %59, %58 : vector<8x512xf32>
    %61 = math.absf %53 : vector<8x512xf32>
    %cst_14 = arith.constant 2.000000e+00 : f32
    %62 = vector.broadcast %cst_14 : f32 to vector<8x512xf32>
    %63 = arith.mulf %62, %61 : vector<8x512xf32>
    %cst_15 = arith.constant 1.000000e+00 : f32
    %64 = vector.broadcast %cst_15 : f32 to vector<8x512xf32>
    %65 = arith.subf %64, %63 : vector<8x512xf32>
    %cst_16 = arith.constant 9.99999996E-13 : f32
    %66 = vector.broadcast %cst_16 : f32 to vector<8x512xf32>
    %67 = arith.maximumf %65, %66 : vector<8x512xf32>
    %68 = math.log %67 : vector<8x512xf32>
    %69 = arith.mulf %60, %68 : vector<8x512xf32>
    %70 = arith.addf %3, %69 : vector<8x512xf32>
    %cst_17 = arith.constant 0.000000e+00 : f32
    %cst_18 = arith.constant 1.000000e+00 : f32
    %71 = vector.broadcast %cst_17 : f32 to vector<8x512xf32>
    %72 = arith.maximumf %71, %70 : vector<8x512xf32>
    %73 = vector.broadcast %cst_18 : f32 to vector<8x512xf32>
    %74 = arith.minimumf %73, %72 : vector<8x512xf32>
    %c0_19 = arith.constant 0 : index
    %c0_20 = arith.constant 0 : index
    %75 = vector.load %arg8[%c0_19, %c0_20] : memref<8x128xf32, #tpu.memory_space<vmem>>, vector<8x128xf32>
    %76 = arith.truncf %74 : vector<8x512xf32> to vector<8x512xbf16>
    %c0_21 = arith.constant 0 : index
    %c0_22 = arith.constant 0 : index
    %77 = vector.load %arg5[%c0_21, %c0_22] : memref<512x128xbf16, #tpu.memory_space<vmem>>, vector<512x128xbf16>
    %cst_23 = arith.constant dense<0.000000e+00> : vector<8x128xf32>
    %78 = tpu.matmul %76, %77, %cst_23 {dimension_numbers = #tpu.dot_dimension_numbers<[1], [0], [0], [1], [0, 0, 1, 1], [], []>} : vector<8x512xbf16>, vector<512x128xbf16>, vector<8x128xf32> -> vector<8x128xf32>
    %79 = arith.addf %75, %78 : vector<8x128xf32>
    %c0_24 = arith.constant 0 : index
    %c0_25 = arith.constant 0 : index
    %80 = vector.load %arg8[%c0_24, %c0_25] : memref<8x128xf32, #tpu.memory_space<vmem>>, vector<8x128xf32>
    tpu.vector_store %arg8[%c0_24, %c0_25], %79 {strides = array<i32>} : memref<8x128xf32, #tpu.memory_space<vmem>>, vector<8x128xf32>,
    %c1_i32 = arith.constant 1 : i32
    %81 = arith.cmpi eq, %arg2, %c1_i32 : i32
    %82 = arith.extui %81 : i1 to i32
    %c0_i32_26 = arith.constant 0 : i32
    %83 = arith.cmpi ne, %82, %c0_i32_26 : i32
    scf.if %83 {
      %c0_27 = arith.constant 0 : index
      %c0_28 = arith.constant 0 : index
      %84 = vector.load %arg8[%c0_27, %c0_28] : memref<8x128xf32, #tpu.memory_space<vmem>>, vector<8x128xf32>
      %c0_29 = arith.constant 0 : index
      %c0_30 = arith.constant 0 : index
      %85 = vector.load %arg6[%c0_29, %c0_30] : memref<1x128xf32, #tpu.memory_space<vmem>>, vector<1x128xf32>
      %86 = vector.broadcast %85 : vector<1x128xf32> to vector<8x128xf32>
      %87 = arith.addf %84, %86 : vector<8x128xf32>
      %c0_31 = arith.constant 0 : index
      %c0_32 = arith.constant 0 : index
      %88 = vector.load %arg7[%c0_31, %c0_32] : memref<8x128xf32, #tpu.memory_space<vmem>>, vector<8x128xf32>
      tpu.vector_store %arg7[%c0_31, %c0_32], %87 {strides = array<i32>} : memref<8x128xf32, #tpu.memory_space<vmem>>, vector<8x128xf32>,
    } else {
    }
    return
  }
  func.func @transform_0(%arg0: i32, %arg1: i32, %arg2: i32, %arg3: memref<1xi32, #tpu.memory_space<smem>>) -> (i32, i32) {
    %c0_i32 = arith.constant 0 : i32
    return %arg0, %arg2 : i32, i32
  }
  func.func @transform_1(%arg0: i32, %arg1: i32, %arg2: i32, %arg3: memref<1xi32, #tpu.memory_space<smem>>) -> (i32, i32) {
    %c0_i32 = arith.constant 0 : i32
    return %arg2, %arg1 : i32, i32
  }
  func.func @transform_2(%arg0: i32, %arg1: i32, %arg2: i32, %arg3: memref<1xi32, #tpu.memory_space<smem>>) -> (i32, i32) {
    %c0_i32 = arith.constant 0 : i32
    %c0_i32_0 = arith.constant 0 : i32
    return %c0_i32, %arg1 : i32, i32
  }
  func.func @transform_3(%arg0: i32, %arg1: i32, %arg2: i32, %arg3: memref<1xi32, #tpu.memory_space<smem>>) -> (i32, i32) {
    %c0_i32 = arith.constant 0 : i32
    return %arg0, %arg1 : i32, i32
  }
}

</mosaic_0001>

<bundles_post_ra>
// kernel: tpu_custom_call.1
= control target key start
LH: loop header
LB: loop body
LE: loop exit
PB: predicated region body
PF: predicated region fallthrough
CT: control target
= control target key end

     0   :  { %s1494_s0 = inlined_call_operand.<no memory space> [shape: s32[1], index: 0, kind: input, shape index: {}]   ;;  %s1495_s1 = inlined_call_operand.hbm [shape: f32[8,1024], index: 1, kind: input, shape index: {}]   ;;  %s1496_s2 = inlined_call_operand.hbm [shape: bf16[1024,128], index: 2, kind: input, shape index: {}]   ;;  %s1497_s3 = inlined_call_operand.vmem [shape: f32[1,128], index: 3, kind: input, shape index: {}]   ;;  %s1498_s4 = inlined_call_operand.hbm [shape: f32[8,128], index: 4, kind: output, shape index: {}]  }
   0x1   :  { %9 = sst [smem:[#allocation4]] %s1494_s0 }
   0x2   :  { %10 = vsyncpa [#allocation6], 0 }
   0x3   :  { %12 = vsyncpa [#allocation6 + $0x1], 0 }
   0x4   :  { %13 = vsyncpa [#allocation9], 0 }
   0x5   :  { %15 = vsyncpa [#allocation9 + $0x1], 0 }
   0x6   :  { %16 = vsyncpa [#allocation7], 0  ;;  %s1333_s17 = smov 0   ;;  %s1335_s18 = smov 0  }
   0x7   :  { %s1337_s19 = smov 0   ;;  %s1339_s20 = smov 0  }
   0x8   :  { %s1341_s21 = smov 0   ;;  %s1343_s22 = smov 0  }
   0x9 LB: > { %s886_s0 = sadd.s32 4294967295, %s1298_s22   ;;  %s34_s23 = sadd.s32 1, %s1294_s21  ;;  %s1298_s22 = sphi %s1343_s22, %s22_s22   ;;  %s1294_s21 = sphi %s1341_s21, %s1506_s21   ;;  %s1290_s20 = sphi %s1339_s20, %s1505_s20   ;;  %s1286_s19 = sphi %s1337_s19, %s1504_s19   ;;  %s1282_s18 = sphi %s1335_s18, %s1503_s18   ;;  %s1278_s17 = sphi %s1333_s17, %s1502_s17  }
   0xa   : > { %p35_p0 = scmp.ge.s32.totalorder %s34_s23, 2  ;;  %s50_s24 = sadd.s32 1, %s1286_s19 }
   0xb   : > { %p57_p1 = scmp.ne.s32.totalorder %s1286_s19, %s1282_s18  ;;  %p58_p2 = scmp.eq.s32.totalorder %s1298_s22, 0 }
   0xc   : > { %s1508_s23 = smov (%p35_p0, %s34_s23), 0  ;;  %p63_p4 = scmp.ne.s32.totalorder %s1282_s18, %s1278_s17 }
   0xd   : > { %p1369_p3 = por %p58_p2, %p57_p1  ;;  %s46_s26 = ssub.s32 %s1294_s21, %s1508_s23 }
   0xe   : > { %p64_p5 = scmp.eq.s32.totalorder %s886_s0, 0  ;;  %p48_p6 = scmp.eq.s32.totalorder %s46_s26, 0 }
   0xf   : > { %p1087_p8 = scmp.lt.s32.totalorder %s1298_s22, 2  ;;  %s1387_s29 = sand.u32 1, %s1286_s19  }
  0x10   : > { %p1378_p7 = por %p64_p5, %p63_p4  ;;  %s1038_s30 = sshll.u32 %s1294_s21, 5 }
  0x11   : > { %s1384_s28 = scalar_select %p48_p6, %s1286_s19, %s50_s24  }
  0x12   : > { %s890_s5 = sshll.u32 %s1387_s29, 5  ;;  %s186_s8 = scalar_lea.hbm %s1495_s1, %s1038_s30 }
  0x13   : > { %s188_s9 = sshll.u32 %s186_s8, 4  ;;  %s179_s10 = scalar_lea.vmem [#allocation5], %s890_s5  ;;  %s189_s9 = int_to_ptr.hbm [resolvable:$true] %s188_s9 }
  0x14   : > { %s190_s11 = sshll.u32 %s179_s10, 4  ;;  %p1396_p9 = pnand %p1087_p8, %p1369_p3  ;;  %s191_s11 = int_to_ptr.vmem [resolvable:$true] %s190_s11 }
  0x15   : > { %p896_p10 = scmp.ge.s32.totalorder %s1298_s22, 1  ;;  %p218_p11 = scmp.lt.s32.totalorder %s1298_s22, 3 }
  0x16   : > { %s893_s13 = sshll.u32 %s1387_s29, 8  ;;  %s176_s14 = scalar_lea.sflag [#allocation6], %s1387_s29 }
  0x17   : > { %1083 = dma.hbm_to_vmem [thread:$0]  (!%p1396_p9), %s189_s9, 512, %s191_s11, %s176_s14  }
  0x18   : > { %p219_p12 = pnand %p896_p10, %p218_p11  ;;  %s1039_s15 = sshll.u32 %s1294_s21, 8 }
  0x19   : > { %s201_s16 = scalar_lea.vmem [#allocation8], %s893_s13  ;;  %s207_s25 = scalar_lea.hbm %s1496_s2, %s1039_s15 }
  0x1a   : > { %s210_s17 = sshll.u32 %s201_s16, 4  ;;  %s208_s30 = sshll.u32 %s207_s25, 4  ;;  %s211_s17 = int_to_ptr.vmem [resolvable:$true] %s210_s17  ;;  %s209_s30 = int_to_ptr.hbm [resolvable:$true] %s208_s30 }
  0x1b   : > { %s198_s5 = scalar_lea.sflag [#allocation9], %s1387_s29  ;;  %s1300_s6 = smov 64  }
  0x1c   : > { %s1301_s7 = smov 4   ;;  %222 = sbr.rel (%p219_p12) target bundleno = 281 (0x119), region = 32 }
  0x1d   : > { %1086 = dma.hbm_to_vmem [thread:$0]  (!%p1396_p9), %s209_s30, 4096, %s211_s17, %s198_s5, %s1300_s6, %s1300_s6, %s1301_s7  }
  0x1e   : > { %s224_s8 = sand.u32 (!%p219_p12), 1, %s1282_s18  }
  0x1f   : > { %s897_s9 = sshll.u32 (!%p219_p12), %s224_s8, 5  ;;  %s225_s10 = scalar_lea.sflag (!%p219_p12), [#allocation6], %s224_s8 }
  0x20   : > { %s1414_s11 = scalar_lea.vmem (!%p219_p12), [#allocation5], %s897_s9 }
  0x21   : > { %1265 = dma.done.wait (%p1378_p7), %s225_s10, 512  }
  0x22   : > { %1267 = vsyncadd (%p1378_p7), %s225_s10, 4294966784  ;;  %s898_s13 = sshll.u32 %s224_s8, 8  ;;  %s235_s29 = scalar_lea.sflag [#allocation9], %s224_s8 }
  0x23   : > { %s1420_s14 = scalar_lea.vmem [#allocation8], %s898_s13 }
  0x24   : > { %1269 = dma.done.wait (%p1378_p7), %s235_s29, 4096  }
  0x25   : > { %1271 = vsyncadd (%p1378_p7), %s235_s29, 4294963200  ;;  %p899_p13 = scmp.ne.s32.totalorder %s1290_s20, 0 }
  0x27   : > { %273 = sbr.rel (%p899_p13) target bundleno = 46 (0x2e), region = 44 }
  0x2c   : > { %v1302_v0 = vmov 0.0  }
  0x2d   : > { %274 = vst [vmem:[#allocation2] sm:$0xff] %v1302_v0 }
  0x2e PF: > { %v1047_v1 = vld [vmem:[%s1420_s14 + $0x38] sm:$0xff]  ;;  %v279_v4 = vlaneseq  ;;  %s900_s27 = sshll.u32 %s1290_s20, 9  ;;  %s1431_s12 = sld [smem:[#allocation4]]  ;;  %v1046_v7 = vld [vmem:[%s1420_s14 + $0x30] sm:$0xff]  ;;  %v1045_v18 = vld [vmem:[%s1420_s14 + $0x28] sm:$0xff] }
  0x2f   : > { %v1055_v2 = vld [vmem:[%s1420_s14 + $0x78] sm:$0xff]  ;;  %v290_v6 = vstv %s900_s27  ;;  %704 = vmatpush.bf16.msra.mxu0 %v1047_v1  ;;  %v1054_v8 = vld [vmem:[%s1420_s14 + $0x70] sm:$0xff]  ;;  %v1053_v19 = vld [vmem:[%s1420_s14 + $0x68] sm:$0xff]  ;;  %p1033_p0 = scmp.ne.s32.totalorder %s1290_s20, 1 }
  0x30   : > { %v1063_v3 = vld [vmem:[%s1420_s14 + $0xb8] sm:$0xff]  ;;  %717 = vmatpush.bf16.msra.mxu1 %v1055_v2  ;;  %v280_v9 = vshrl.u32 %v279_v4, 7  ;;  %v282_v10 = vand.u32 127, %v279_v4  ;;  %v1062_v11 = vld [vmem:[%s1420_s14 + $0xb0] sm:$0xff]  ;;  %v1061_v23 = vld [vmem:[%s1420_s14 + $0xa8] sm:$0xff] }
  0x31   : > { %v1071_v5 = vld [vmem:[%s1420_s14 + $0xf8] sm:$0xff]  ;;  %730 = vmatpush.bf16.msra.mxu2 %v1063_v3  ;;  %v1070_v12 = vld [vmem:[%s1420_s14 + $0xf0] sm:$0xff]  ;;  %v1069_v24 = vld [vmem:[%s1420_s14 + $0xe8] sm:$0xff] }
  0x32   : > { %743 = vmatpush.bf16.msra.mxu3 %v1071_v5  ;;  %v291_v13 = vadd.s32 %v290_v6, %v282_v10  ;;  %v295_v14 = vmul.u32 1024, %v280_v9  ;;  %v283_v15 = vadd.s32 128, %v282_v10  ;;  %v284_v16 = vadd.s32 256, %v282_v10  ;;  %v1044_v31 = vld [vmem:[%s1420_s14 + $0x20] sm:$0xff]  ;;  %v1043_v43 = vld [vmem:[%s1420_s14 + $0x18] sm:$0xff]  ;;  %v1042_v55 = vld [vmem:[%s1420_s14 + $0x10] sm:$0xff] }
  0x33   : > { %v285_v17 = vadd.s32 384, %v282_v10  ;;  %705 = vmatpush.bf16.msra.mxu0 %v1046_v7  ;;  %v1052_v32 = vld [vmem:[%s1420_s14 + $0x60] sm:$0xff]  ;;  %v1051_v44 = vld [vmem:[%s1420_s14 + $0x58] sm:$0xff]  ;;  %v1050_v56 = vld [vmem:[%s1420_s14 + $0x50] sm:$0xff] }
  0x34   : > { %718 = vmatpush.bf16.msra.mxu1 %v1054_v8  ;;  %v296_v20 = vadd.s32 %v295_v14, %v291_v13  ;;  %s301_s15 = smul.u32 2654435769, %s1431_s12  ;;  %v292_v21 = vadd.s32 %v290_v6, %v283_v15  ;;  %v293_v22 = vadd.s32 %v290_v6, %v284_v16  ;;  %v1060_v35 = vld [vmem:[%s1420_s14 + $0xa0] sm:$0xff]  ;;  %v1059_v47 = vld [vmem:[%s1420_s14 + $0x98] sm:$0xff]  ;;  %v1058_v59 = vld [vmem:[%s1420_s14 + $0x90] sm:$0xff] }
  0x35   : > { %731 = vmatpush.bf16.msra.mxu2 %v1062_v11  ;;  %v294_v25 = vadd.s32 %v290_v6, %v285_v17  ;;  %v1068_v36 = vld [vmem:[%s1420_s14 + $0xe0] sm:$0xff]  ;;  %v1067_v48 = vld [vmem:[%s1420_s14 + $0xd8] sm:$0xff]  ;;  %v1066_v60 = vld [vmem:[%s1420_s14 + $0xd0] sm:$0xff] }
  0x36   : > { %744 = vmatpush.bf16.msra.mxu3 %v1070_v12  ;;  %v302_v26 = vstv %s301_s15  ;;  %v297_v27 = vadd.s32 %v295_v14, %v292_v21  ;;  %v298_v28 = vadd.s32 %v295_v14, %v293_v22  ;;  %v1041_v3 = vld [vmem:[%s1420_s14 + $0x8] sm:$0xff]  ;;  %v1040_v15 = vld [vmem:[%s1420_s14] sm:$0xff] }
  0x37   : > { %v303_v29 = vxor.u32 %v302_v26, %v296_v20  ;;  %v299_v30 = vadd.s32 %v295_v14, %v294_v25  ;;  %706 = vmatpush.bf16.msra.mxu0 %v1045_v18  ;;  %v1049_v4 = vld [vmem:[%s1420_s14 + $0x48] sm:$0xff]  ;;  %v1048_v16 = vld [vmem:[%s1420_s14 + $0x40] sm:$0xff] }
  0x38   : > { %719 = vmatpush.bf16.msra.mxu1 %v1053_v19  ;;  %v304_v33 = vxor.u32 %v302_v26, %v297_v27  ;;  %v305_v34 = vxor.u32 %v302_v26, %v298_v28  ;;  %v1057_v7 = vld [vmem:[%s1420_s14 + $0x88] sm:$0xff]  ;;  %v1056_v19 = vld [vmem:[%s1420_s14 + $0x80] sm:$0xff] }
  0x39   : > { %732 = vmatpush.bf16.msra.mxu2 %v1061_v23  ;;  %v307_v37 = vshrl.u32 %v303_v29, 16  ;;  %v306_v38 = vxor.u32 %v302_v26, %v299_v30  ;;  %v1065_v8 = vld [vmem:[%s1420_s14 + $0xc8] sm:$0xff]  ;;  %v1064_v20 = vld [vmem:[%s1420_s14 + $0xc0] sm:$0xff] }
  0x3a   : > { %745 = vmatpush.bf16.msra.mxu3 %v1069_v24  ;;  %v308_v39 = vshrl.u32 %v304_v33, 16  ;;  %v309_v40 = vshrl.u32 %v305_v34, 16 }
  0x3b   : > { %v311_v41 = vxor.u32 %v307_v37, %v303_v29  ;;  %v310_v42 = vshrl.u32 %v306_v38, 16  ;;  %707 = vmatpush.bf16.msra.mxu0 %v1044_v31 }
  0x3c   : > { %720 = vmatpush.bf16.msra.mxu1 %v1052_v32  ;;  %v312_v45 = vxor.u32 %v308_v39, %v304_v33  ;;  %v313_v46 = vxor.u32 %v309_v40, %v305_v34 }
  0x3d   : > { %733 = vmatpush.bf16.msra.mxu2 %v1060_v35  ;;  %v315_v49 = vmul.u32 2246822507, %v311_v41  ;;  %v314_v50 = vxor.u32 %v310_v42, %v306_v38 }
  0x3e   : > { %746 = vmatpush.bf16.msra.mxu3 %v1068_v36  ;;  %v316_v51 = vmul.u32 2246822507, %v312_v45  ;;  %v317_v52 = vmul.u32 2246822507, %v313_v46 }
  0x3f   : > { %v319_v53 = vshrl.u32 %v315_v49, 13  ;;  %v318_v54 = vmul.u32 2246822507, %v314_v50  ;;  %708 = vmatpush.bf16.msra.mxu0 %v1043_v43 }
  0x40   : > { %721 = vmatpush.bf16.msra.mxu1 %v1051_v44  ;;  %v320_v57 = vshrl.u32 %v316_v51, 13  ;;  %v321_v58 = vshrl.u32 %v317_v52, 13 }
  0x41   : > { %734 = vmatpush.bf16.msra.mxu2 %v1059_v47  ;;  %v323_v61 = vxor.u32 %v319_v53, %v315_v49  ;;  %v322_v62 = vshrl.u32 %v318_v54, 13 }
  0x42   : > { %747 = vmatpush.bf16.msra.mxu3 %v1067_v48  ;;  %v324_v63 = vxor.u32 %v320_v57, %v316_v51  ;;  %v325_v0 = vxor.u32 %v321_v58, %v317_v52 }
  0x43   : > { %v327_v1 = vmul.u32 3266489909, %v323_v61  ;;  %v326_v2 = vxor.u32 %v322_v62, %v318_v54  ;;  %709 = vmatpush.bf16.msra.mxu0 %v1042_v55 }
  0x44   : > { %722 = vmatpush.bf16.msra.mxu1 %v1050_v56  ;;  %v328_v5 = vmul.u32 3266489909, %v324_v63  ;;  %v329_v6 = vmul.u32 3266489909, %v325_v0 }
  0x45   : > { %735 = vmatpush.bf16.msra.mxu2 %v1058_v59  ;;  %v331_v9 = vshrl.u32 %v327_v1, 16  ;;  %v330_v10 = vmul.u32 3266489909, %v326_v2 }
  0x46   : > { %748 = vmatpush.bf16.msra.mxu3 %v1066_v60  ;;  %v332_v11 = vshrl.u32 %v328_v5, 16  ;;  %v333_v12 = vshrl.u32 %v329_v6, 16 }
  0x47   : > { %v335_v13 = vxor.u32 %v331_v9, %v327_v1  ;;  %v334_v14 = vshrl.u32 %v330_v10, 16  ;;  %710 = vmatpush.bf16.msra.mxu0 %v1041_v3 }
  0x48   : > { %723 = vmatpush.bf16.msra.mxu1 %v1049_v4  ;;  %v336_v17 = vxor.u32 %v332_v11, %v328_v5  ;;  %v337_v18 = vxor.u32 %v333_v12, %v329_v6 }
  0x49   : > { %736 = vmatpush.bf16.msra.mxu2 %v1057_v7  ;;  %v339_v21 = vxor.u32 2654435769, %v335_v13  ;;  %v338_v22 = vxor.u32 %v334_v14, %v330_v10 }
  0x4a   : > { %749 = vmatpush.bf16.msra.mxu3 %v1065_v8  ;;  %v340_v23 = vxor.u32 2654435769, %v336_v17  ;;  %v341_v24 = vxor.u32 2654435769, %v337_v18 }
  0x4b   : > { %v343_v25 = vshrl.u32 %v339_v21, 16  ;;  %v342_v26 = vxor.u32 2654435769, %v338_v22  ;;  %711 = vmatpush.bf16.msra.mxu0 %v1040_v15 }
  0x4c   : > { %724 = vmatpush.bf16.msra.mxu1 %v1048_v16  ;;  %v344_v27 = vshrl.u32 %v340_v23, 16  ;;  %v345_v28 = vshrl.u32 %v341_v24, 16 }
  0x4d   : > { %737 = vmatpush.bf16.msra.mxu2 %v1056_v19  ;;  %v347_v29 = vxor.u32 %v343_v25, %v339_v21  ;;  %v346_v30 = vshrl.u32 %v342_v26, 16 }
  0x4e   : > { %750 = vmatpush.bf16.msra.mxu3 %v1064_v20  ;;  %v348_v31 = vxor.u32 %v344_v27, %v340_v23  ;;  %v349_v32 = vxor.u32 %v345_v28, %v341_v24  ;;  %v1303_v20 = vmov -1.0  }
  0x4f   : > { %v351_v33 = vmul.u32 2246822507, %v347_v29  ;;  %v350_v34 = vxor.u32 %v346_v30, %v342_v26 }
  0x50   : > { %v352_v35 = vmul.u32 2246822507, %v348_v31  ;;  %v353_v36 = vmul.u32 2246822507, %v349_v32  ;;  %v275_v32 = vld [vmem:[%s1414_s11] sm:$0xff] }
  0x51   : > { %v355_v37 = vshrl.u32 %v351_v33, 13  ;;  %v354_v38 = vmul.u32 2246822507, %v350_v34 }
  0x52   : > { %v356_v39 = vshrl.u32 %v352_v35, 13  ;;  %v357_v40 = vshrl.u32 %v353_v36, 13 }
  0x53   : > { %v359_v41 = vxor.u32 %v355_v37, %v351_v33  ;;  %v358_v42 = vshrl.u32 %v354_v38, 13 }
  0x54   : > { %v360_v43 = vxor.u32 %v356_v39, %v352_v35  ;;  %v361_v44 = vxor.u32 %v357_v40, %v353_v36  ;;  %v276_v35 = vld [vmem:[%s1414_s11 + $0x8] sm:$0xff] }
  0x55   : > { %v363_v45 = vmul.u32 3266489909, %v359_v41  ;;  %v362_v46 = vxor.u32 %v358_v42, %v354_v38 }
  0x56   : > { %v364_v47 = vmul.u32 3266489909, %v360_v43  ;;  %v365_v48 = vmul.u32 3266489909, %v361_v44  ;;  %v277_v44 = vld [vmem:[%s1414_s11 + $0x10] sm:$0xff] }
  0x57   : > { %v367_v49 = vshrl.u32 %v363_v45, 16  ;;  %v366_v50 = vmul.u32 3266489909, %v362_v46 }
  0x58   : > { %v368_v51 = vshrl.u32 %v364_v47, 16  ;;  %v369_v52 = vshrl.u32 %v365_v48, 16 }
  0x59   : > { %v371_v53 = vxor.u32 %v367_v49, %v363_v45  ;;  %v370_v54 = vshrl.u32 %v366_v50, 16 }
  0x5a   : > { %v372_v55 = vxor.u32 %v368_v51, %v364_v47  ;;  %v373_v56 = vxor.u32 %v369_v52, %v365_v48  ;;  %v278_v48 = vld [vmem:[%s1414_s11 + $0x18] sm:$0xff] }
  0x5b   : > { %v375_v57 = vshrl.u32 %v371_v53, 9  ;;  %v374_v58 = vxor.u32 %v370_v54, %v366_v50 }
  0x5c   : > { %v376_v59 = vshrl.u32 %v372_v55, 9  ;;  %v377_v60 = vshrl.u32 %v373_v56, 9 }
  0x5d   : > { %v379_v61 = vor.u32 1065353216, %v375_v57  ;;  %v378_v62 = vshrl.u32 %v374_v58, 9 }
  0x5e   : > { %v380_v63 = vor.u32 1065353216, %v376_v59  ;;  %v381_v0 = vor.u32 1065353216, %v377_v60 }
  0x5f   : > { %v901_v1 = vadd.f32 -1.5, %v379_v61  ;;  %v382_v2 = vor.u32 1065353216, %v378_v62 }
  0x60   : > { %v902_v3 = vadd.f32 -1.5, %v380_v63  ;;  %v903_v5 = vadd.f32 -1.5, %v381_v0 }
  0x61   : > { %v403_v4 = vand.u32 2147483647, %v901_v1  ;;  %v904_v6 = vadd.f32 -1.5, %v382_v2  ;;  %vm391_vm0 = vcmp.ge.f32.partialorder %v901_v1, 0.0 }
  0x62   : > { %v404_v7 = vand.u32 2147483647, %v902_v3  ;;  %v405_v11 = vand.u32 2147483647, %v903_v5  ;;  %vm392_vm1 = vcmp.ge.f32.partialorder %v902_v3, 0.0  ;;  %v395_v21 = vsel %vm391_vm0, 1.0, %v1303_v20 }
  0x63   : > { %v407_v8 = vmul.f32 2.0, %v403_v4  ;;  %v406_v12 = vand.u32 2147483647, %v904_v6  ;;  %v396_v24 = vsel %vm392_vm1, 1.0, %v1303_v20  ;;  %vm393_vm2 = vcmp.ge.f32.partialorder %v903_v5, 0.0 }
  0x64   : > { %v408_v9 = vmul.f32 2.0, %v404_v7  ;;  %v409_v15 = vmul.f32 2.0, %v405_v11  ;;  %vm394_vm3 = vcmp.ge.f32.partialorder %v904_v6, 0.0  ;;  %v399_v25 = vmul.f32 -0.1, %v395_v21  ;;  %v443_v7 = vld [vmem:[#allocation2] sm:$0xff] }
  0x65   : > { %v411_v10 = vsub.f32 1.0, %v407_v8  ;;  %v410_v16 = vmul.f32 2.0, %v406_v12  ;;  %v400_v27 = vmul.f32 -0.1, %v396_v24  ;;  %v397_v28 = vsel %vm393_vm2, 1.0, %v1303_v20 }
  0x66   : > { %v412_v13 = vsub.f32 1.0, %v408_v9  ;;  %v413_v18 = vsub.f32 1.0, %v409_v15  ;;  %v398_v31 = vsel %vm394_vm3, 1.0, %v1303_v20  ;;  %v401_v36 = vmul.f32 -0.1, %v397_v28 }
  0x67   : > { %v415_v14 = vmax.f32 %v411_v10, 1e-12  ;;  %v414_v19 = vsub.f32 1.0, %v410_v16  ;;  %v402_v39 = vmul.f32 -0.1, %v398_v31 }
  0x68   : > { %v416_v17 = vmax.f32 %v412_v13, 1e-12  ;;  %v417_v22 = vmax.f32 %v413_v18, 1e-12 }
  0x69   : > { %1143 = vlog2.f32 %v415_v14  ;;  %v418_v23 = vmax.f32 %v414_v19, 1e-12 }
  0x6a   : > { %1145 = vlog2.f32 %v416_v17 }
  0x6b   : > { %1147 = vlog2.f32 %v417_v22 }
  0x6c   : > { %1149 = vlog2.f32 %v418_v23 }
  0x6f   : > { %v1144_v26 = vpop.eup %1143 }
  0x70   : > { %v1146_v29 = vpop.eup %1145  ;;  %v420_v30 = vmul.f32 0.6931472, %v1144_v26 }
  0x71   : > { %v422_v33 = vmul.f32 0.6931472, %v1146_v29  ;;  %v1148_v37 = vpop.eup %1147 }
  0x72   : > { %v427_v34 = vmul.f32 %v420_v30, %v399_v25  ;;  %v1150_v40 = vpop.eup %1149  ;;  %v424_v42 = vmul.f32 0.6931472, %v1148_v37 }
  0x73   : > { %v428_v38 = vmul.f32 %v422_v33, %v400_v27  ;;  %v426_v45 = vmul.f32 0.6931472, %v1150_v40 }
  0x74   : > { %v431_v41 = vadd.f32 %v427_v34, %v275_v32  ;;  %v429_v47 = vmul.f32 %v424_v42, %v401_v36 }
  0x75   : > { %v432_v43 = vadd.f32 %v428_v38, %v276_v35  ;;  %v430_v50 = vmul.f32 %v426_v45, %v402_v39 }
  0x76   : > { %v435_v46 = vmax.f32 %v431_v41, 0.0  ;;  %v433_v52 = vadd.f32 %v429_v47, %v277_v44 }
  0x77   : > { %v436_v49 = vmax.f32 %v432_v43, 0.0  ;;  %v434_v54 = vadd.f32 %v430_v50, %v278_v48 }
  0x78   : > { %v439_v51 = vmin.f32 %v435_v46, 1.0  ;;  %v437_v56 = vmax.f32 %v433_v52, 0.0 }
  0x79   : > { %v440_v53 = vmin.f32 %v436_v49, 1.0  ;;  %v438_v58 = vmax.f32 %v434_v54, 0.0 }
  0x7a   : > { %v444_v55 = vpack.c.bf16 %v439_v51, %v439_v51  ;;  %v441_v59 = vmin.f32 %v437_v56, 1.0 }
  0x7b   : > { %v445_v57 = vpack.c.bf16 %v440_v53, %v440_v53  ;;  %v442_v60 = vmin.f32 %v438_v58, 1.0 }
  0x7c   : > { %712 = vmatmul.bf16.vlgmr.msra.gmra.mxu0 %v444_v55  ;;  %v446_v61 = vpack.c.bf16 %v441_v59, %v441_v59 }
  0x7d   : > { %725 = vmatmul.bf16.vlgmr.msra.gmra.mxu1 %v445_v57  ;;  %v447_v62 = vpack.c.bf16 %v442_v60, %v442_v60 }
  0x7e   : > { %738 = vmatmul.bf16.vlgmr.msra.gmra.mxu2 %v446_v61 }
  0x7f   : > { %751 = vmatmul.bf16.vlgmr.msra.gmra.mxu3 %v447_v62 }
  0xf9   : > { %v713_v63 = vpop.f32.mrf.mxu0 }
  0xfa   : > { %v726_v0 = vpop.f32.mrf.mxu1 }
  0xfb   : > { %v727_v1 = vadd.f32 %v726_v0, %v713_v63 }
 0x101   : > { %v715_v2 = vpop.f32.mrf.mxu0  ;;  %v739_v4 = vpop.f32.mrf.mxu2 }
 0x102   : > { %v728_v3 = vpop.f32.mrf.mxu1  ;;  %v740_v5 = vadd.f32 %v739_v4, %v727_v1  ;;  %v752_v6 = vpop.f32.mrf.mxu3 }
 0x104   : > { %v753_v8 = vadd.f32 %v752_v6, %v740_v5 }
 0x106   : > { %v756_v9 = vadd.f32 %v753_v8, %v443_v7  ;;  %761 = sbr.rel (%p1033_p0) target bundleno = 275 (0x113), region = 48 }
 0x108   : > { %757 = vst [vmem:[#allocation2] sm:$0xff] %v756_v9 }
 0x109   : > { %v741_v10 = vpop.f32.mrf.mxu2 }
 0x10a   : > { %v754_v11 = vpop.f32.mrf.mxu3 }
 0x10b   : > { %v1151_v13 = vld [vmem:[%s1497_s3] ss:$0 sm:$0xff] }
 0x10f   : > { %v762_v12 = vld [vmem:[#allocation2] sm:$0xff] }
 0x110   : > { %v767_v14 = vadd.f32 %v1151_v13, %v762_v12 }
 0x112   : > { %768 = vst [vmem:[#allocation10] sm:$0xff] %v767_v14 }
 0x113 PF: > { %p1088_p1 = scmp.eq.s32.totalorder %s886_s0, 1  ;;  %s780_s25 = sshll.u32 %s1498_s4, 4  ;;  %s781_s25 = int_to_ptr.hbm [resolvable:$true] %s780_s25 }
 0x114   : > { %s1304_s30 = smov [#allocation10]  }
 0x115   : > { %s778_s5 = sshll.u32 %s1304_s30, 4  ;;  %s779_s5 = int_to_ptr.vmem [resolvable:$true] %s778_s5 }
 0x116   : > { %1077 = dma.vmem_to_hbm [thread:$0]  (%p1088_p1), %s779_s5, 128, %s781_s25, [#allocation7]  }
 0x117   : > { %1273 = dma.done.wait (%p1088_p1), [#allocation7], 128  }
 0x118   : > { %1275 = vsyncadd (%p1088_p1), [#allocation7], 4294967168 }
 0x119 PF: > { %s22_s22 = sadd.s32 1, %s1298_s22   ;;  %s1502_s17 = smov %s1282_s18 }
 0x11a   : > { %p19_p2 = scmp.ge.s32.totalorder %s22_s22, 4   ;;  %s1503_s18 = smov %s1286_s19 }
 0x11b   : > { %s1504_s19 = smov %s1384_s28  ;;  %s1505_s20 = smov %s1294_s21 }
 0x11c   : > { %s1506_s21 = smov %s1508_s23  ;;  %21 = sbr.rel (!%p19_p2) target bundleno = 9 (0x9), region = 94 }
 0x121   :  { %794 = vsyncpa [#allocation6], 1 }
 0x122   :  { %796 = vsyncpa [#allocation6 + $0x1], 1 }
 0x123   :  { %797 = vsyncpa [#allocation9], 1 }
 0x124   :  { %799 = vsyncpa [#allocation9 + $0x1], 1 }
 0x125   :  { %800 = vsyncpa [#allocation7], 1 }
 0x126   :  { %802 = vsyncpa [#allocation7 + $0x1], 1 }

</bundles_post_ra>
